<compile_context>
chip_gen: v5e
topology: v5e:2x2
jax: 0.10.0
libtpu: 0.0.40
codegen_flags: <defaults>
</compile_context>

<pallas_src>
import math

import numpy as np
import jax
import jax.numpy as jnp
from jax import lax
from jax.experimental import pallas as pl
from jax.experimental.pallas import tpu as pltpu


# ---------------------------------------------------------------------------
# Host-side helpers (exact NumPy replicas of the repo's utils + build_targets)
# TODO(synk): build_targets is inherently sequential, data-dependent per-GT
# assignment (it runs on CPU in the original module too) — kept in NumPy.
# ---------------------------------------------------------------------------
def _multi_bbox_ious_np(boxes1, boxes2):
    # center-format (x1y1x2y2=False), boxes shape (4, N)
    mx = np.minimum(boxes1[0] - boxes1[2] / 2.0, boxes2[0] - boxes2[2] / 2.0)
    Mx = np.maximum(boxes1[0] + boxes1[2] / 2.0, boxes2[0] + boxes2[2] / 2.0)
    my = np.minimum(boxes1[1] - boxes1[3] / 2.0, boxes2[1] - boxes2[3] / 2.0)
    My = np.maximum(boxes1[1] + boxes1[3] / 2.0, boxes2[1] + boxes2[3] / 2.0)
    w1, h1 = boxes1[2], boxes1[3]
    w2, h2 = boxes2[2], boxes2[3]
    uw, uh = Mx - mx, My - my
    cw, ch = w1 + w2 - uw, h1 + h2 - uh
    mask = (cw <= 0) | (ch <= 0)
    area1, area2 = w1 * h1, w2 * h2
    carea = np.where(mask, 0.0, cw * ch)
    uarea = area1 + area2 - carea
    return carea / uarea


def _bbox_iou_np(box1, box2):
    return float(_multi_bbox_ious_np(box1.reshape(4, 1), box2.reshape(4, 1))[0])


def _build_targets_np(pred_boxes, target, anchors, nA, nH, nW,
                      net_width, net_height, stride, ignore_thresh, rescore):
    nB = target.shape[0]
    anchor_step = anchors.shape[1]
    conf_mask = np.ones((nB, nA, nH, nW), np.float32)
    coord_mask = np.zeros((nB, nA, nH, nW), np.float32)
    cls_mask = np.zeros((nB, nA, nH, nW), np.float32)
    tcoord = np.zeros((4, nB, nA, nH, nW), np.float32)
    tconf = np.zeros((nB, nA, nH, nW), np.float32)
    tcls = np.zeros((nB, nA, nH, nW), np.float32)
    twidth, theight = net_width / stride, net_height / stride
    nAnchors = nA * nH * nW
    nPixels = nH * nW
    nGT = nRecall = nRecall75 = 0
    for b in range(nB):
        cur_pred_boxes = pred_boxes[b * nAnchors:(b + 1) * nAnchors].T  # (4, nAnchors)
        cur_ious = np.zeros(nAnchors, np.float32)
        tbox = target[b].reshape(-1, 5)
        for t in range(50):
            if tbox[t][1] == 0:
                break
            gx, gy = tbox[t][1] * nW, tbox[t][2] * nH
            gw, gh = tbox[t][3] * twidth, tbox[t][4] * theight
            cur_gt = np.tile(np.array([gx, gy, gw, gh], np.float32).reshape(4, 1),
                             (1, nAnchors))
            cur_ious = np.maximum(cur_ious,
                                  _multi_bbox_ious_np(cur_pred_boxes, cur_gt))
        ignore_ix = (cur_ious > ignore_thresh).reshape(nA, nH, nW)
        conf_mask[b][ignore_ix] = 0
        for t in range(50):
            if tbox[t][1] == 0:
                break
            nGT += 1
            gx, gy = tbox[t][1] * nW, tbox[t][2] * nH
            gw, gh = float(tbox[t][3] * twidth), float(tbox[t][4] * theight)
            gi, gj = int(gx), int(gy)
            tmp_gt = np.tile(np.array([0, 0, gw, gh], np.float32).reshape(4, 1),
                             (1, nA))
            anchor_boxes = np.concatenate(
                [np.zeros((nA, anchor_step), np.float32), anchors], axis=1).T
            best_n = int(np.argmax(_multi_bbox_ious_np(tmp_gt, anchor_boxes)))
            gt_box = np.array([gx, gy, gw, gh], np.float32)
            pred_box = pred_boxes[b * nAnchors + best_n * nPixels + gj * nW + gi]
            iou = _bbox_iou_np(gt_box, pred_box)
            coord_mask[b, best_n, gj, gi] = 1
            cls_mask[b, best_n, gj, gi] = 1
            conf_mask[b, best_n, gj, gi] = 1
            tcoord[0, b, best_n, gj, gi] = gx - gi
            tcoord[1, b, best_n, gj, gi] = gy - gj
            tcoord[2, b, best_n, gj, gi] = math.log(gw / anchors[best_n][0])
            tcoord[3, b, best_n, gj, gi] = math.log(gh / anchors[best_n][1])
            tcls[b, best_n, gj, gi] = tbox[t][0]
            tconf[b, best_n, gj, gi] = iou if rescore else 1.0
            if iou > 0.5:
                nRecall += 1
                if iou > 0.75:
                    nRecall75 += 1
    return (nGT, nRecall, nRecall75, coord_mask, conf_mask, cls_mask,
            tcoord, tconf, tcls)


def _largest_divisor_leq(n, cap):
    cap = max(1, min(int(cap), n))
    for d in range(cap, 0, -1):
        if n % d == 0:
            return d
    return 1


# ---------------------------------------------------------------------------
# YoloLayer forward (Pallas hot path + host target assignment)
# ---------------------------------------------------------------------------
def yolo_layer_forward(output, target, *, anchors, anchor_mask, num_classes,
                       num_anchors, stride=32, net_width=None, net_height=None,
                       ignore_thresh=0.5, rescore=0):
    output = jnp.asarray(output, jnp.float32)       # NCHW, C = nA*(5+nC)
    nB, _, nH, nW = output.shape
    nA = len(anchor_mask)
    nC = num_classes
    anchor_step = len(anchors) // num_anchors
    if net_width is None:
        net_width = nW * stride
    if net_height is None:
        net_height = nH * stride

    masked_anchors = []
    for m in anchor_mask:
        masked_anchors += anchors[m * anchor_step:(m + 1) * anchor_step]
    masked_anchors = np.array(
        [a / stride for a in masked_anchors], np.float32).reshape(nA, anchor_step)

    HW = nH * nW
    nBA = nB * nA
    nCh = 5 + nC

    # ----- per-generation block sizing (v7x has 64 MiB VMEM, v5e/v6e 128) ---
    try:
        vmem_cap = int(pltpu.get_tpu_info().vmem_capacity_bytes)
    except Exception:
        vmem_cap = 64 * 1024 * 1024
    vmem_limit = int(min(vmem_cap // 2, 48 * 1024 * 1024))

    per_slab_bytes = (nCh + 9) * HW * 4             # loss-kernel input bytes / slab
    target_block = 2 * 1024 * 1024                   # ~2 MB blocks to amortize grid
    cap_tb = min(target_block // per_slab_bytes,
                 max(1, int(0.4 * vmem_limit) // (2 * per_slab_bytes)))
    TB = _largest_divisor_leq(nBA, max(1, cap_tb))   # slabs per grid step
    n_steps = nBA // TB

    # Free, contiguous reshape: (nB, nA*(5+nC), nH, nW) -> (nB*nA, 5+nC, nH*nW).
    # Each grid step works on TB (b, a) slabs: channels on sublanes, spatial
    # positions on lanes.  No transpose / extra HBM pass needed.
    raw5 = output.reshape(nBA, nCh, HW)
    raw_coord = raw5[:, 0:4, :]                      # decode uses tx,ty,tw,th only

    # Hoisted grid coordinates: (2, HW), resident across all grid steps.
    gx = np.tile(np.arange(nW, dtype=np.float32), nH)
    gy = np.repeat(np.arange(nH, dtype=np.float32), nW)
    gxy_dev = jnp.asarray(np.stack([gx, gy], axis=0))          # (2, HW)

    # Per-slab anchor (w, h), reproducing the reference repo's repeat() quirk:
    # anchor_w/h are laid out anchor-major over nB*HW, while the coord slabs
    # are b-major (i = b*nA + a), so the anchor row used for slab i is i // nB.
    # (Verified against the PyTorch reference.)
    slab_rows = np.arange(nBA) // nB
    awh_dev = jnp.asarray(
        masked_anchors[slab_rows][:, 0:2].reshape(nBA, 2, 1).astype(np.float32))

    # -- kernel 1: box decode (pred_boxes only; needed on host by build_targets)
    def decode_kernel(awh_ref, gxy_ref, raw_ref, pb_ref):
        xy = jax.nn.sigmoid(raw_ref[:, 0:2, :]) + gxy_ref[...]   # (TB,2,HW)+(2,HW)
        wh = jnp.exp(raw_ref[:, 2:4, :]) * awh_ref[...]          # lane-bcast (TB,2,1)
        pb_ref[...] = jnp.concatenate([xy, wh], axis=1)          # single 4-row store

    pred_boxes = pl.pallas_call(
        decode_kernel,
        out_shape=jax.ShapeDtypeStruct((nBA, 4, HW), jnp.float32),
        grid=(n_steps,),
        in_specs=[pl.BlockSpec((TB, 2, 1), lambda i: (i, 0, 0)),
                  pl.BlockSpec((2, HW), lambda i: (0, 0)),        # resident constant
                  pl.BlockSpec((TB, 4, HW), lambda i: (i, 0, 0))],
        out_specs=pl.BlockSpec((TB, 4, HW), lambda i: (i, 0, 0)),
        compiler_params=pltpu.CompilerParams(
            dimension_semantics=("parallel",),
            vmem_limit_bytes=vmem_limit),
    )(awh_dev, gxy_dev, raw_coord)

    # -- host: build targets (sequential, data-dependent; CPU in the original too)
    pred_boxes_np = np.asarray(jax.device_get(pred_boxes))       # (nBA, 4, HW)
    pred_boxes_np = pred_boxes_np.transpose(0, 2, 1).reshape(-1, 4)  # (N, 4)
    target_np = np.asarray(target, np.float32)
    (nGT, nRecall, nRecall75, coord_mask, conf_mask, cls_mask,
     tcoord, tconf, tcls) = _build_targets_np(
        pred_boxes_np, target_np, masked_anchors, nA, nH, nW,
        net_width, net_height, stride, ignore_thresh, rescore)
    del nGT, nRecall, nRecall75                      # stats only in the original

    # Pack all targets into one per-slab tensor (one DMA stream):
    # rows 0:4 = tcoord, 4 = coord_mask, 5 = tconf, 6 = conf_mask,
    # 7 = cls_mask, 8 = tcls (class index as float).
    # TODO(synk): shrink/overlap this host round trip (uint8 masks, vectorized
    # build_targets); it dominates end-to-end latency for real batch sizes.
    tgt = np.zeros((nBA, 9, HW), np.float32)
    tgt[:, 0:4, :] = tcoord.reshape(4, nBA, HW).transpose(1, 0, 2)
    tgt[:, 4, :] = coord_mask.reshape(nBA, HW)
    tgt[:, 5, :] = tconf.reshape(nBA, HW)
    tgt[:, 6, :] = conf_mask.reshape(nBA, HW)
    tgt[:, 7, :] = cls_mask.reshape(nBA, HW)
    tgt[:, 8, :] = tcls.reshape(nBA, HW)
    tgt_dev = jnp.asarray(tgt)

    # -- kernel 2: masked losses, accumulated on-device into a resident block.
    # TODO(synk): on v7x, CORE_PARALLEL sharding of the slab axis would need a
    # size-2 core axis with per-core accumulators; kept single-accumulator here.
    def loss_kernel(raw_ref, tgt_ref, out_ref):
        @pl.when(pl.program_id(0) == 0)
        def _init():
            out_ref[...] = jnp.zeros_like(out_ref)

        # coord: MSE(sum)/2 on (sigmoid(tx,ty), raw(tw,th)) vs tcoord, masked
        cmask = tgt_ref[:, 4:5, :]                               # {0,1}, bcast rows
        dxy = (jax.nn.sigmoid(raw_ref[:, 0:2, :]) - tgt_ref[:, 0:2, :]) * cmask
        dwh = (raw_ref[:, 2:4, :] - tgt_ref[:, 2:4, :]) * cmask
        p_coord = 0.5 * jnp.sum(
            jnp.sum(dxy * dxy + dwh * dwh, axis=1, keepdims=True), axis=0)  # (1,HW)

        # conf: MSE(sum) on sigmoid(conf) vs tconf, masked
        dc = (jax.nn.sigmoid(raw_ref[:, 4:5, :]) - tgt_ref[:, 5:6, :]) * tgt_ref[:, 6:7, :]
        p_conf = jnp.sum(dc * dc, axis=0)                                    # (1,HW)

        # cls: sum CrossEntropy over masked positions (target logit via iota select)
        cls = raw_ref[:, 5:5 + nC, :]                            # (TB,nC,HW) logits
        m = jnp.max(cls, axis=1, keepdims=True)
        lse = m + jnp.log(jnp.sum(jnp.exp(cls - m), axis=1, keepdims=True))
        tcls_i = tgt_ref[:, 8:9, :].astype(jnp.int32)            # (TB,1,HW)
        cls_iota = lax.broadcasted_iota(jnp.int32, (TB, nC, HW), 1)
        tgt_logit = jnp.sum(jnp.where(cls_iota == tcls_i, cls, 0.0),
                            axis=1, keepdims=True)
        p_cls = jnp.sum(tgt_ref[:, 7:8, :] * (lse - tgt_logit), axis=0)      # (1,HW)

        # per-lane partials accumulated into the resident output block
        out_ref[0:3, :] += jnp.concatenate([p_coord, p_conf, p_cls], axis=0)

    partials = pl.pallas_call(
        loss_kernel,
        out_shape=jax.ShapeDtypeStruct((8, HW), jnp.float32),
        grid=(n_steps,),
        in_specs=[pl.BlockSpec((TB, nCh, HW), lambda i: (i, 0, 0)),
                  pl.BlockSpec((TB, 9, HW), lambda i: (i, 0, 0))],
        out_specs=pl.BlockSpec((8, HW), lambda i: (0, 0)),        # accumulator
        compiler_params=pltpu.CompilerParams(
            dimension_semantics=("arbitrary",),
            vmem_limit_bytes=vmem_limit),
    )(raw5, tgt_dev)

    loss = jnp.sum(partials[0:3, :])          # finish lane reduction in XLA
    return loss


# ---------------------------------------------------------------------------
if __name__ == "__main__":
    key = jax.random.PRNGKey(0)

    # Small, module-consistent shapes.
    nB, nH, nW = 2, 8, 8
    num_classes = 4
    anchors = [10, 13, 16, 30, 33, 23, 30, 61, 62, 45, 59, 119,
               116, 90, 156, 198, 373, 326]
    num_anchors = 9
    anchor_mask = [6, 7, 8]
    nA = len(anchor_mask)
    out_ch = nA * (5 + num_classes)                  # 27

    x = jax.random.normal(key, (nB, out_ch, nH, nW), dtype=jnp.float32)

    # Deterministic targets: (nB, 50*5) = (class, x, y, w, h) normalized, zero-padded.
    target = np.zeros((nB, 50 * 5), np.float32)
    target[0, 0:5] = [1.0, 0.50, 0.50, 0.30, 0.40]
    target[0, 5:10] = [2.0, 0.25, 0.75, 0.10, 0.20]
    target[1, 0:5] = [0.0, 0.60, 0.40, 0.50, 0.30]

    loss = yolo_layer_forward(
        x, target,
        anchors=anchors, anchor_mask=anchor_mask,
        num_classes=num_classes, num_anchors=num_anchors,
        stride=32, net_width=nW * 32, net_height=nH * 32)

    loss = jax.block_until_ready(loss)
    assert np.isfinite(float(loss))
    print("KERNEL_OK")
</pallas_src>

<mosaic_0001>
module attributes {stable_mosaic.version = 11 : i64} {
  func.func @decode_kernel(%arg0: i32, %arg1: memref<6x2x1xf32, #tpu.memory_space<vmem>>, %arg2: memref<2x64xf32, #tpu.memory_space<vmem>>, %arg3: memref<6x4x64xf32, #tpu.memory_space<vmem>>, %arg4: memref<6x4x64xf32, #tpu.memory_space<vmem>>) attributes {dimension_semantics = [#tpu.dimension_semantics<parallel>], iteration_bounds = array<i64: 1>, scalar_prefetch = 0 : i64, scratch_operands = 0 : i64, tpu.core_type = #tpu.core_type<tc>, window_params = [{transform_indices = @transform_0, window_bounds = array<i64: 6, 2, 1>}, {pipeline_mode = #tpu.pipeline_mode<synchronous>, transform_indices = @transform_1, window_bounds = array<i64: 2, 64>}, {transform_indices = @transform_2, window_bounds = array<i64: 6, 4, 64>}, {transform_indices = @transform_3, window_bounds = array<i64: 6, 4, 64>}]} {
    %c0 = arith.constant 0 : index
    %c0_0 = arith.constant 0 : index
    %c0_1 = arith.constant 0 : index
    %0 = vector.load %arg3[%c0, %c0_0, %c0_1] : memref<6x4x64xf32, #tpu.memory_space<vmem>>, vector<6x2x64xf32>
    %1 = arith.negf %0 : vector<6x2x64xf32>
    %2 = math.exp %1 : vector<6x2x64xf32>
    %cst = arith.constant 1.000000e+00 : f32
    %3 = vector.broadcast %cst : f32 to vector<6x2x64xf32>
    %4 = arith.addf %3, %2 : vector<6x2x64xf32>
    %5 = arith.divf %3, %4 : vector<6x2x64xf32>
    %c0_2 = arith.constant 0 : index
    %c0_3 = arith.constant 0 : index
    %6 = vector.load %arg2[%c0_2, %c0_3] : memref<2x64xf32, #tpu.memory_space<vmem>>, vector<2x64xf32>
    %7 = vector.shape_cast %6 : vector<2x64xf32> to vector<1x2x64xf32>
    %8 = vector.broadcast %7 : vector<1x2x64xf32> to vector<6x2x64xf32>
    %9 = arith.addf %5, %8 : vector<6x2x64xf32>
    %c0_4 = arith.constant 0 : index
    %c2 = arith.constant 2 : index
    %c0_5 = arith.constant 0 : index
    %10 = vector.load %arg3[%c0_4, %c2, %c0_5] : memref<6x4x64xf32, #tpu.memory_space<vmem>>, vector<6x2x64xf32>
    %11 = math.exp %10 : vector<6x2x64xf32>
    %c0_6 = arith.constant 0 : index
    %c0_7 = arith.constant 0 : index
    %c0_8 = arith.constant 0 : index
    %12 = vector.load %arg1[%c0_6, %c0_7, %c0_8] : memref<6x2x1xf32, #tpu.memory_space<vmem>>, vector<6x2x1xf32>
    %13 = vector.broadcast %12 : vector<6x2x1xf32> to vector<6x2x64xf32>
    %14 = arith.mulf %11, %13 : vector<6x2x64xf32>
    %15 = tpu.concatenate %9, %14 in 1 : vector<6x2x64xf32>, vector<6x2x64xf32> -> vector<6x4x64xf32>
    %c0_9 = arith.constant 0 : index
    %c0_10 = arith.constant 0 : index
    %c0_11 = arith.constant 0 : index
    %16 = vector.load %arg4[%c0_9, %c0_10, %c0_11] : memref<6x4x64xf32, #tpu.memory_space<vmem>>, vector<6x4x64xf32>
    tpu.vector_store %arg4[%c0_9, %c0_10, %c0_11], %15 {strides = array<i32>} : memref<6x4x64xf32, #tpu.memory_space<vmem>>, vector<6x4x64xf32>,
    return
  }
  func.func @transform_0(%arg0: i32) -> (i32, i32, i32) {
    %c0_i32 = arith.constant 0 : i32
    %c0_i32_0 = arith.constant 0 : i32
    %c0_i32_1 = arith.constant 0 : i32
    return %arg0, %c0_i32, %c0_i32_0 : i32, i32, i32
  }
  func.func @transform_1(%arg0: i32) -> (i32, i32) {
    %c0_i32 = arith.constant 0 : i32
    %c0_i32_0 = arith.constant 0 : i32
    %c0_i32_1 = arith.constant 0 : i32
    return %c0_i32, %c0_i32_0 : i32, i32
  }
  func.func @transform_2(%arg0: i32) -> (i32, i32, i32) {
    %c0_i32 = arith.constant 0 : i32
    %c0_i32_0 = arith.constant 0 : i32
    %c0_i32_1 = arith.constant 0 : i32
    return %arg0, %c0_i32, %c0_i32_0 : i32, i32, i32
  }
  func.func @transform_3(%arg0: i32) -> (i32, i32, i32) {
    %c0_i32 = arith.constant 0 : i32
    %c0_i32_0 = arith.constant 0 : i32
    %c0_i32_1 = arith.constant 0 : i32
    return %arg0, %c0_i32, %c0_i32_0 : i32, i32, i32
  }
}

</mosaic_0001>

<bundles_post_ra>
// kernel: tpu_custom_call.1
= control target key start
LH: loop header
LB: loop body
LE: loop exit
PB: predicated region body
PF: predicated region fallthrough
CT: control target
= control target key end

     0   :  { %8 = vsyncpa [#allocation3], 0  ;;  %s555_s0 = inlined_call_operand.vmem [shape: f32[6,2,1], index: 0, kind: input, shape index: {}]   ;;  %s556_s1 = inlined_call_operand.vmem [shape: f32[2,64], index: 1, kind: input, shape index: {}]   ;;  %s557_s2 = inlined_call_operand.hbm [shape: f32[6,4,64], index: 2, kind: input, shape index: {}]   ;;  %s558_s3 = inlined_call_operand.hbm [shape: f32[6,4,64], index: 3, kind: output, shape index: {}]  }
   0x1   :  { %9 = vsyncpa [#allocation4], 0  ;;  %s18_s14 = sshll.u32 %s557_s2, 4  ;;  %s371_s15 = smov [#allocation2]   ;;  %s19_s14 = int_to_ptr.hbm [resolvable:$true] %s18_s14 }
   0x2   :  { %s20_s16 = sshll.u32 %s371_s15, 4  ;;  %s372_s17 = smov 64   ;;  %s21_s16 = int_to_ptr.vmem [resolvable:$true] %s20_s16 }
   0x3   :  { %s373_s18 = smov 4  }
   0x4   :  { %26 = dma.hbm_to_vmem [thread:$0]  %s19_s14, 384, %s21_s16, [#allocation3], %s372_s17, %s372_s17, %s373_s18  }
   0x5   :  { %367 = dma.done.wait [#allocation3], 384  }
   0x6   :  { %368 = vsyncadd [#allocation3], 4294966912  ;;  %v374_v0 = vmov 0   ;;  %v178_v1 = vld [vmem:[%s555_s0 + $0x4] sm:$0x3]  ;;  %vm236_vm7 = vcmask 1041408  }
   0x7   :  { %281 = vset.pattern.permute.xlu1 %v374_v0  ;;  %280 = vset.pattern.permute.xlu0 %v374_v0  ;;  %v176_v2 = vld [vmem:[%s555_s0] sm:$0x3]  ;;  %v180_v3 = vld [vmem:[%s555_s0 + $0x8] sm:$0x3]  ;;  %v179_v4 = vld [vmem:[%s555_s0 + $0x6] sm:$0x3] }
   0x8   :  { %282 = vset.pattern.permute.xlu2 %v374_v0  ;;  %194 = vperm.xlu1 %281, %v178_v1   ;;  %v177_v5 = vld [vmem:[%s555_s0 + $0x2] sm:$0x3]  ;;  %v181_v6 = vld [vmem:[%s555_s0 + $0xa] sm:$0x3]  ;;  %v35_v7 = vld [vmem:[#allocation2 + $0x10] sm:$0x3] }
   0x9   :  { %184 = vperm.xlu0 %280, %v176_v2   ;;  %204 = vperm.xlu2 %282, %v180_v3   ;;  %v36_v8 = vld [vmem:[#allocation2 + $0x14] sm:$0x3]  ;;  %v273_v9 = vmul.f32 -1.442695, %v35_v7  ;;  %v33_v11 = vld [vmem:[#allocation2 + $0x8] sm:$0x3] }
   0xa   :  { %v274_v10 = vmul.f32 -1.442695, %v36_v8  ;;  %v31_v12 = vld [vmem:[#allocation2] sm:$0x3]  ;;  %v271_v16 = vmul.f32 -1.442695, %v33_v11 }
   0xb   :  { %283 = vpow2.f32 %v273_v9  ;;  %v269_v18 = vmul.f32 -1.442695, %v31_v12  ;;  %v34_v19 = vld [vmem:[#allocation2 + $0xc] sm:$0x3]  ;;  %v32_v20 = vld [vmem:[#allocation2 + $0x4] sm:$0x3] }
   0xc   :  { %285 = vpow2.f32 %v274_v10  ;;  %v272_v22 = vmul.f32 -1.442695, %v34_v19  ;;  %v162_v25 = vld [vmem:[#allocation2 + $0x12] sm:$0x3]  ;;  %v270_v26 = vmul.f32 -1.442695, %v32_v20 }
   0xd   :  { %v172_v30 = vmul.f32 1.442695, %v162_v25  ;;  %v163_v40 = vld [vmem:[#allocation2 + $0x16] sm:$0x3]  ;;  %v451_v52 = vld [vmem:[%s556_s1] sm:$0x3] }
   0xe   :  { %v174_v46 = vmul.f32 1.442695, %v163_v40  ;;  %vm243_vm8 = vcmask 519168   ;;  %v160_v9 = vld [vmem:[#allocation2 + $0xa] sm:$0x3]  ;;  %s375_s1 = smov [#allocation5]  }
   0xf   :  { %v158_v11 = vld [vmem:[#allocation2 + $0x2] sm:$0x3]  ;;  %s254_s4 = sshll.u32 %s375_s1, 4  ;;  %s256_s7 = sshll.u32 %s558_s3, 4  ;;  %s255_s4 = int_to_ptr.vmem [resolvable:$true] %s254_s4  ;;  %s257_s7 = int_to_ptr.hbm [resolvable:$true] %s256_s7 }
  0x10   :  { %199 = vperm.xlu1 %281, %v179_v4   ;;  %v164_v20 = vmul.f32 1.442695, %v158_v11 }
  0x11   :  { %189 = vperm.xlu0 %280, %v177_v5   ;;  %209 = vperm.xlu2 %282, %v181_v6   ;;  %v284_v13 = vpop.eup %283 }
  0x12   :  { %v286_v14 = vpop.eup %285  ;;  %v59_v15 = vadd.f32 1.0, %v284_v13 }
  0x13   :  { %v420_v17 = vadd.f32 1.0, %v286_v14 }
  0x14   :  { %287 = vrcp.f32 %v59_v15  ;;  %vm126_vm0 = vweird.f32 %v59_v15  ;;  %v132_v35 = vand.u32 2147483648, %v59_v15  ;;  %v130_v37 = vand.u32 2147483647, %v59_v15 }
  0x15   :  { %289 = vrcp.f32 %v420_v17  ;;  %vm141_vm4 = vweird.f32 %v420_v17  ;;  %v147_v53 = vand.u32 2147483648, %v420_v17  ;;  %v145_v56 = vand.u32 2147483647, %v420_v17 }
  0x16   :  { %291 = vpow2.f32 %v271_v16  ;;  %v133_v43 = vor.u32 1.1754944e-38, %v132_v35  ;;  %vm131_vm3 = vcmp.eq.f32.partialorder %v130_v37, 8.507059e+37  ;;  %v159_v35 = vld [vmem:[#allocation2 + $0x6] sm:$0x3] }
  0x17   :  { %293 = vpow2.f32 %v269_v18  ;;  %v148_v62 = vor.u32 1.1754944e-38, %v147_v53  ;;  %vm146_vm9 = vcmp.eq.f32.partialorder %v145_v56, 8.507059e+37 }
  0x18   :  { %295 = vpow2.f32 %v272_v22 }
  0x19   :  { %297 = vpow2.f32 %v270_v26 }
  0x1a   :  { %v288_v21 = vpop.eup %287  ;;  %299 = vpow2.f32 %v172_v30 }
  0x1b   :  { %v423_v23 = vpop.eup %289  ;;  %v122_v24 = vmul.f32 %v288_v21, %v59_v15  ;;  %vm127_vm1 = vweird.f32 %v288_v21  ;;  %v168_v15 = vmul.f32 1.442695, %v160_v9 }
  0x1c   :  { %v292_v27 = vpop.eup %291  ;;  %v137_v31 = vmul.f32 %v423_v23, %v420_v17  ;;  %vm431_vm2 = vmor %vm126_vm0, %vm127_vm1  ;;  %vm142_vm5 = vweird.f32 %v423_v23 }
  0x1d   :  { %v294_v28 = vpop.eup %293  ;;  %v123_v29 = vsub.f32 1.0, %v122_v24  ;;  %v427_v33 = vadd.f32 1.0, %v292_v27  ;;  %vm458_vm6 = vmor %vm141_vm4, %vm142_vm5 }
  0x1e   :  { %v429_v34 = vadd.f32 1.0, %v294_v28  ;;  %v138_v38 = vsub.f32 1.0, %v137_v31  ;;  %v296_v41 = vpop.eup %295 }
  0x1f   :  { %v124_v32 = vmul.f32 %v288_v21, %v123_v29  ;;  %301 = vrcp.f32 %v427_v33  ;;  %v298_v42 = vpop.eup %297  ;;  %v440_v47 = vadd.f32 1.0, %v296_v41  ;;  %vm96_vm10 = vweird.f32 %v427_v33 }
  0x20   :  { %303 = vrcp.f32 %v429_v34  ;;  %v139_v45 = vmul.f32 %v423_v23, %v138_v38  ;;  %v300_v48 = vpop.eup %299  ;;  %v444_v49 = vadd.f32 1.0, %v298_v42  ;;  %vm66_vm12 = vweird.f32 %v429_v34 }
  0x21   :  { %v125_v36 = vadd.f32 %v288_v21, %v124_v32  ;;  %305 = vpow2.f32 %v174_v46  ;;  %v72_v22 = vand.u32 2147483648, %v429_v34  ;;  %v100_v25 = vand.u32 2147483647, %v427_v33  ;;  %v161_v32 = vld [vmem:[#allocation2 + $0xe] sm:$0x3] }
  0x22   :  { %v140_v55 = vadd.f32 %v423_v23, %v139_v45  ;;  %307 = vrcp.f32 %v440_v47  ;;  %v70_v26 = vand.u32 2147483647, %v429_v34  ;;  %v170_v39 = vmul.f32 1.442695, %v161_v32 }
  0x23   :  { %v129_v44 = vsel %vm431_vm2, %v288_v21, %v125_v36  ;;  %309 = vrcp.f32 %v444_v49  ;;  %v102_v21 = vand.u32 2147483648, %v427_v33  ;;  %vm101_vm0 = vcmp.eq.f32.partialorder %v100_v25, 8.507059e+37 }
  0x24   :  { %v134_v51 = vsel %vm131_vm3, %v133_v43, %v129_v44  ;;  %v144_v1 = vsel %vm458_vm6, %v423_v23, %v140_v55  ;;  %311 = vpow2.f32 %v168_v15  ;;  %vm71_vm1 = vcmp.eq.f32.partialorder %v70_v26, 8.507059e+37 }
  0x25   :  { %v446_v50 = vpop.eup %301  ;;  %v156_v59 = vadd.f32 %v451_v52, %v134_v51  ;;  %v149_v6 = vsel %vm146_vm9, %v148_v62, %v144_v1  ;;  %313 = vpow2.f32 %v164_v20  ;;  %v73_v36 = vor.u32 1.1754944e-38, %v72_v22 }
  0x26   :  { %v454_v54 = vpop.eup %303  ;;  %v92_v61 = vmul.f32 %v446_v50, %v427_v33  ;;  %v157_v12 = vadd.f32 %v451_v52, %v149_v6  ;;  %vm97_vm11 = vweird.f32 %v446_v50  ;;  %v103_v33 = vor.u32 1.1754944e-38, %v102_v21 }
  0x27   :  { %v62_v63 = vmul.f32 %v454_v54, %v429_v34  ;;  %v306_v2 = vpop.eup %305  ;;  %vm67_vm13 = vweird.f32 %v454_v54  ;;  %vm496_vm14 = vmor %vm96_vm10, %vm97_vm11  ;;  %vm111_vm2 = vweird.f32 %v440_v47  ;;  %v166_v41 = vmul.f32 1.442695, %v159_v35 }
  0x28   :  { %v93_v4 = vsub.f32 1.0, %v92_v61  ;;  %v473_v5 = vpop.eup %307  ;;  %vm501_vm15 = vmor %vm66_vm12, %vm67_vm13  ;;  %v117_v44 = vand.u32 2147483648, %v440_v47  ;;  %vm81_vm4 = vweird.f32 %v444_v49  ;;  %v87_v51 = vand.u32 2147483648, %v444_v49 }
  0x29   :  { %v63_v7 = vsub.f32 1.0, %v62_v63  ;;  %v476_v8 = vpop.eup %309  ;;  %v107_v17 = vmul.f32 %v473_v5, %v440_v47  ;;  %vm112_vm3 = vweird.f32 %v473_v5  ;;  %315 = vpow2.f32 %v170_v39 }
  0x2a   :  { %v94_v14 = vmul.f32 %v446_v50, %v93_v4  ;;  %v77_v18 = vmul.f32 %v476_v8, %v444_v49  ;;  %v312_v42 = vpop.eup %311  ;;  %vm82_vm5 = vweird.f32 %v476_v8  ;;  %vm522_vm6 = vmor %vm111_vm2, %vm112_vm3  ;;  %317 = vpow2.f32 %v166_v41 }
  0x2b   :  { %v64_v16 = vmul.f32 %v454_v54, %v63_v7  ;;  %v108_v29 = vsub.f32 1.0, %v107_v17  ;;  %v314_v45 = vpop.eup %313  ;;  %vm527_vm9 = vmor %vm81_vm4, %vm82_vm5  ;;  %v118_v61 = vor.u32 1.1754944e-38, %v117_v44  ;;  %v88_v62 = vor.u32 1.1754944e-38, %v87_v51 }
  0x2c   :  { %v95_v24 = vadd.f32 %v446_v50, %v94_v14  ;;  %v78_v30 = vsub.f32 1.0, %v77_v18 }
  0x2d   :  { %v65_v28 = vadd.f32 %v454_v54, %v64_v16  ;;  %v109_v38 = vmul.f32 %v473_v5, %v108_v29 }
  0x2e   :  { %v99_v34 = vsel %vm496_vm14, %v446_v50, %v95_v24  ;;  %v79_v40 = vmul.f32 %v476_v8, %v78_v30  ;;  %v85_v50 = vand.u32 2147483647, %v444_v49 }
  0x2f   :  { %v69_v37 = vsel %vm501_vm15, %v454_v54, %v65_v28  ;;  %v104_v43 = vsel %vm101_vm0, %v103_v33, %v99_v34  ;;  %v110_v53 = vadd.f32 %v473_v5, %v109_v38 }
  0x30   :  { %v74_v46 = vsel %vm71_vm1, %v73_v36, %v69_v37  ;;  %v80_v55 = vadd.f32 %v476_v8, %v79_v40  ;;  %vm86_vm11 = vcmp.eq.f32.partialorder %v85_v50, 8.507059e+37 }
  0x31   :  { %v152_v49 = vadd.f32 %v451_v52, %v74_v46  ;;  %v114_v1 = vsel %vm522_vm6, %v473_v5, %v110_v53 }
  0x63   :  { %v205_v57 = vpop.permute.xlu2 %204 }
  0x64   :  { %v216_v60 = vmul.f32 %v300_v48, %v205_v57  ;;  %v115_v48 = vand.u32 2147483647, %v440_v47  ;;  %v154_v47 = vadd.f32 %v451_v52, %v104_v43 }
  0x66   :  { %v228_v0 = vrot.slane %v216_v60, 6  ;;  %vm116_vm10 = vcmp.eq.f32.partialorder %v115_v48, 8.507059e+37 }
  0x67   :  { %v119_v9 = vsel %vm116_vm10, %v118_v61, %v114_v1 }
  0x68   :  { %v241_v3 = vsel %vm236_vm7, %v156_v59, %v228_v0  ;;  %v155_v5 = vadd.f32 %v451_v52, %v119_v9 }
  0x69   :  { %248 = vst.msk [vmem:[#allocation5 + $0x10] sm:$0xf] %vm243_vm8, %v241_v3  ;;  %v316_v3 = vpop.eup %315 }
  0x6a   :  { %v318_v7 = vpop.eup %317 }
  0x6b   :  { %v210_v10 = vpop.permute.xlu2 %209 }
  0x6c   :  { %v217_v13 = vmul.f32 %v306_v2, %v210_v10  ;;  %v84_v2 = vsel %vm527_vm9, %v476_v8, %v80_v55 }
  0x6d   :  { %v89_v10 = vsel %vm86_vm11, %v88_v62, %v84_v2 }
  0x6e   :  { %v229_v19 = vrot.slane %v217_v13, 6  ;;  %v153_v14 = vadd.f32 %v451_v52, %v89_v10 }
  0x70   :  { %v242_v23 = vsel %vm236_vm7, %v157_v12, %v229_v19 }
  0x71   :  { %249 = vst.msk [vmem:[#allocation5 + $0x14] sm:$0xf] %vm243_vm8, %v242_v23 }
  0x7a   :  { %v195_v56 = vpop.permute.xlu1 %194 }
  0x7b   :  { %v185_v57 = vpop.permute.xlu0 %184  ;;  %v214_v59 = vmul.f32 %v312_v42, %v195_v56 }
  0x7c   :  { %v212_v60 = vmul.f32 %v314_v45, %v185_v57 }
  0x7d   :  { %v226_v63 = vrot.slane %v214_v59, 6 }
  0x7e   :  { %v224_v0 = vrot.slane %v212_v60, 6 }
  0x7f   :  { %v239_v4 = vsel %vm236_vm7, %v154_v47, %v226_v63 }
  0x80   :  { %v237_v6 = vsel %vm236_vm7, %v152_v49, %v224_v0  ;;  %246 = vst.msk [vmem:[#allocation5 + $0x8] sm:$0xf] %vm243_vm8, %v239_v4 }
  0x81   :  { %244 = vst.msk [vmem:[#allocation5] sm:$0xf] %vm243_vm8, %v237_v6 }
  0x82   :  { %v200_v11 = vpop.permute.xlu1 %199 }
  0x83   :  { %v190_v12 = vpop.permute.xlu0 %189  ;;  %v215_v13 = vmul.f32 %v316_v3, %v200_v11 }
  0x84   :  { %v213_v8 = vmul.f32 %v318_v7, %v190_v12 }
  0x85   :  { %v227_v15 = vrot.slane %v215_v13, 6 }
  0x86   :  { %v225_v16 = vrot.slane %v213_v8, 6 }
  0x87   :  { %v240_v17 = vsel %vm236_vm7, %v155_v5, %v227_v15 }
  0x88   :  { %v238_v18 = vsel %vm236_vm7, %v153_v14, %v225_v16  ;;  %247 = vst.msk [vmem:[#allocation5 + $0xc] sm:$0xf] %vm243_vm8, %v240_v17 }
  0x89   :  { %245 = vst.msk [vmem:[#allocation5 + $0x4] sm:$0xf] %vm243_vm8, %v238_v18 }
  0x8a   :  { %262 = dma.vmem_to_hbm [thread:$0]  %s255_s4, 384, %s257_s7, [#allocation4], %s372_s17, %s372_s17, %s373_s18  }
  0x8b   :  { %369 = dma.done.wait [#allocation4], 384  }
  0x8c   :  { %370 = vsyncadd [#allocation4], 4294966912 }
  0x8d   :  { %267 = vsyncpa [#allocation3], 1 }
  0x8e   :  { %268 = vsyncpa [#allocation4], 1 }

</bundles_post_ra>
